<compile_context>
chip_gen: v6e
topology: v6e:2x2x1
jax: 0.10.0
libtpu: 0.0.40
codegen_flags: <defaults>
</compile_context>

<pallas_src>
import functools

import jax
import jax.numpy as jnp
from jax.experimental import pallas as pl
from jax.experimental.pallas import tpu as pltpu

_VMEM_LIMIT_BYTES = 32 * 1024 * 1024  # comfortable on v5e/v6e (128 MiB) and v7x (64 MiB)


def _round_up(x, m):
    return (x + m - 1) // m * m


# ---------------------------------------------------------------------------
# Tiled batched matmul kernel (MXU): out[g] = A[g] @ B[g], optional fused tanh.
# ---------------------------------------------------------------------------
def _bmm_kernel(a_ref, b_ref, o_ref, acc_ref, *, activation):
    @pl.when(pl.program_id(3) == 0)
    def _init():
        acc_ref[...] = jnp.zeros_like(acc_ref)

    acc_ref[...] += jnp.dot(a_ref[...], b_ref[...],
                            preferred_element_type=jnp.float32)

    @pl.when(pl.program_id(3) == pl.num_programs(3) - 1)
    def _finalize():
        acc = acc_ref[...]
        if activation == "tanh":
            acc = jnp.tanh(acc)
        o_ref[...] = acc.astype(o_ref.dtype)


def pallas_bmm(a, b, *, activation=None, out_dtype=jnp.bfloat16,
               tm=256, tn=256, tk=512):
    """a: (G, M, K) or (M, K); b: (G, K, N) or (K, N). bf16 MXU, f32 accumulate."""
    squeeze = False
    if a.ndim == 2:
        a, b, squeeze = a[None], b[None], True
    g, m, k = a.shape
    gb, kb, n = b.shape
    assert g == gb and k == kb

    tm = min(tm, _round_up(m, 16))     # sublane-aligned (bf16 packs 16 sublanes)
    tn = min(tn, _round_up(n, 128))    # lane-dense output tiles
    tk = min(tk, _round_up(k, 128))
    mp, np_, kp = _round_up(m, tm), _round_up(n, tn), _round_up(k, tk)

    a_p = jnp.zeros((g, mp, kp), jnp.bfloat16).at[:, :m, :k].set(
        a.astype(jnp.bfloat16))
    b_p = jnp.zeros((g, kp, np_), jnp.bfloat16).at[:, :k, :n].set(
        b.astype(jnp.bfloat16))

    grid = (g, mp // tm, np_ // tn, kp // tk)
    out_bytes = g * mp * np_ * jnp.dtype(out_dtype).itemsize
    cost = pl.CostEstimate(
        flops=2 * g * mp * np_ * kp,
        transcendentals=(g * mp * np_) if activation == "tanh" else 0,
        bytes_accessed=int(a_p.size * 2 + b_p.size * 2 + out_bytes))

    out = pl.pallas_call(
        functools.partial(_bmm_kernel, activation=activation),
        out_shape=jax.ShapeDtypeStruct((g, mp, np_), out_dtype),
        grid_spec=pltpu.PrefetchScalarGridSpec(
            num_scalar_prefetch=0,
            grid=grid,
            in_specs=[
                pl.BlockSpec((None, tm, tk), lambda gg, i, j, kk: (gg, i, kk)),
                pl.BlockSpec((None, tk, tn), lambda gg, i, j, kk: (gg, kk, j)),
            ],
            out_specs=pl.BlockSpec((None, tm, tn),
                                   lambda gg, i, j, kk: (gg, i, j)),
            scratch_shapes=[pltpu.VMEM((tm, tn), jnp.float32)]),
        compiler_params=pltpu.CompilerParams(
            dimension_semantics=("parallel", "parallel", "parallel", "arbitrary"),
            vmem_limit_bytes=_VMEM_LIMIT_BYTES),
        cost_estimate=cost,
    )(a_p, b_p)

    out = out[:, :m, :n]
    return out[0] if squeeze else out


# ---------------------------------------------------------------------------
# BatchNorm2d (training-mode batch stats) + ReLU, on (M, C) lane-dense layout.
# ---------------------------------------------------------------------------
def _bn_stats_kernel(x_ref, sum_ref, sqsum_ref):
    @pl.when(pl.program_id(0) == 0)
    def _init():
        sum_ref[...] = jnp.zeros_like(sum_ref)
        sqsum_ref[...] = jnp.zeros_like(sqsum_ref)

    x = x_ref[...].astype(jnp.float32)          # (tm, Cpad)
    sum_ref[...] += jnp.sum(x, axis=0, keepdims=True)
    sqsum_ref[...] += jnp.sum(x * x, axis=0, keepdims=True)


def _bn_apply_relu_kernel(x_ref, scale_ref, shift_ref, o_ref):
    x = x_ref[...].astype(jnp.float32)
    y = x * scale_ref[...] + shift_ref[...]
    o_ref[...] = jnp.maximum(y, 0.0).astype(o_ref.dtype)


def pallas_batchnorm_relu(x_nhwc, gamma, beta, *, eps=1e-5, tm=512):
    """Training-mode BatchNorm2d (batch statistics) fused with ReLU; NHWC in/out."""
    n, h, w, c = x_nhwc.shape
    m = n * h * w
    cpad = _round_up(c, 128)
    tm = min(tm, _round_up(m, 16))
    mp = _round_up(m, tm)
    x2 = x_nhwc.reshape(m, c)
    xp = jnp.zeros((mp, cpad), x2.dtype).at[:m, :c].set(x2)   # zero padding keeps sums exact
    grid = (mp // tm,)

    s, sq = pl.pallas_call(
        _bn_stats_kernel,
        out_shape=(jax.ShapeDtypeStruct((1, cpad), jnp.float32),
                   jax.ShapeDtypeStruct((1, cpad), jnp.float32)),
        grid_spec=pltpu.PrefetchScalarGridSpec(
            num_scalar_prefetch=0,
            grid=grid,
            in_specs=[pl.BlockSpec((tm, cpad), lambda i: (i, 0))],
            out_specs=(pl.BlockSpec((1, cpad), lambda i: (0, 0)),
                       pl.BlockSpec((1, cpad), lambda i: (0, 0)))),
        compiler_params=pltpu.CompilerParams(
            dimension_semantics=("arbitrary",),
            vmem_limit_bytes=_VMEM_LIMIT_BYTES),
    )(xp)

    inv_m = 1.0 / float(m)
    mean = s * inv_m
    var = jnp.maximum(sq * inv_m - mean * mean, 0.0)   # biased batch variance (PyTorch norm)
    g_p = jnp.zeros((1, cpad), jnp.float32).at[0, :c].set(gamma.astype(jnp.float32))
    b_p = jnp.zeros((1, cpad), jnp.float32).at[0, :c].set(beta.astype(jnp.float32))
    inv_std = jax.lax.rsqrt(var + eps)
    scale = g_p * inv_std
    shift = b_p - mean * scale

    out = pl.pallas_call(
        _bn_apply_relu_kernel,
        out_shape=jax.ShapeDtypeStruct((mp, cpad), jnp.bfloat16),
        grid_spec=pltpu.PrefetchScalarGridSpec(
            num_scalar_prefetch=0,
            grid=grid,
            in_specs=[pl.BlockSpec((tm, cpad), lambda i: (i, 0)),
                      pl.BlockSpec((1, cpad), lambda i: (0, 0)),
                      pl.BlockSpec((1, cpad), lambda i: (0, 0))],
            out_specs=pl.BlockSpec((tm, cpad), lambda i: (i, 0))),
        compiler_params=pltpu.CompilerParams(
            dimension_semantics=("parallel",),
            vmem_limit_bytes=_VMEM_LIMIT_BYTES),
    )(xp, scale, shift)

    return out[:m, :c].reshape(n, h, w, c)


# ---------------------------------------------------------------------------
# ConvTranspose2d layers (im2col glue in JAX, matmul + epilogue in Pallas)
# ---------------------------------------------------------------------------
def conv_transpose_initial(z, w):
    """ConvTranspose2d(z_dim, cout, k=4, s=1, p=0, bias=False) on a 1x1 input.

    out[n, kh, kw, co] = sum_ci z[n, ci] * w[ci, co, kh, kw]  -> pure matmul (NHWC out).
    """
    nb, cin = z.shape
    cin2, cout, kh, kw = w.shape
    assert cin == cin2
    b = jnp.transpose(w, (0, 2, 3, 1)).reshape(cin, kh * kw * cout)
    out = pallas_bmm(z, b, out_dtype=jnp.bfloat16)     # (N, kh*kw*cout)
    return out.reshape(nb, kh, kw, cout)


def conv_transpose_s2(x_nhwc, w, *, activation=None, out_dtype=jnp.bfloat16):
    """ConvTranspose2d(cin, cout, k=4, s=2, p=1, bias=False), NHWC in/out.

    Phase decomposition: output phase (ph, pw) is a stride-1 2x2 conv of the
    1-padded input with sub-kernel wf[:, :, ph::2, pw::2]; the 4 phases run as
    one batched Pallas matmul (K = 4*Cin, not 16*Cin; no zero-stuffing).
    """
    nb, h, wd, cin = x_nhwc.shape
    cin2, cout, kk, _ = w.shape
    assert cin == cin2 and kk == 4
    ho, wo = 2 * h, 2 * wd

    xp = jnp.pad(x_nhwc, ((0, 0), (1, 1), (1, 1), (0, 0)))
    wf = w[:, :, ::-1, ::-1]                             # spatially flipped kernel

    # TODO(synk): gather the 4 taps inside the kernel (windowed/Element-offset
    # DMA) instead of materializing the per-phase im2col matrices in HBM.
    a_list, b_list = [], []
    for ph in range(2):
        for pw in range(2):
            taps, wtaps = [], []
            for da in range(2):
                for db in range(2):
                    taps.append(xp[:, ph + da:ph + da + h, pw + db:pw + db + wd, :])
                    wtaps.append(wf[:, :, ph + 2 * da, pw + 2 * db])      # (Cin, Cout)
            a_list.append(jnp.concatenate(taps, axis=-1).reshape(nb * h * wd, 4 * cin))
            b_list.append(jnp.concatenate(wtaps, axis=0))                  # (4*Cin, Cout)

    a = jnp.stack(a_list, axis=0)    # (4, M, 4*Cin)
    b = jnp.stack(b_list, axis=0)    # (4, 4*Cin, Cout)
    y = pallas_bmm(a, b, activation=activation, out_dtype=out_dtype)       # (4, M, Cout)

    # Interleave phases: y[ph*2+pw, n*h*w + i*w + j, c] -> out[n, 2i+ph, 2j+pw, c]
    y = y.reshape(2, 2, nb, h, wd, cout)
    y = jnp.transpose(y, (2, 3, 0, 4, 1, 5)).reshape(nb, ho, wo, cout)
    return y


# ---------------------------------------------------------------------------
# Generator: parameter init (matching the PyTorch __init__) and forward pass
# ---------------------------------------------------------------------------
def make_generator_params(key, input_size, n_channel, z_dim, ngf):
    assert input_size % 16 == 0, "isize has to be a multiple of 16"
    cngf, tisize = ngf // 2, 4
    while tisize != input_size:
        cngf *= 2
        tisize *= 2

    conv_shapes = [(z_dim, cngf)]
    bn_channels = [cngf]
    csize = 4
    while csize < input_size // 2:
        conv_shapes.append((cngf, cngf // 2))
        bn_channels.append(cngf // 2)
        cngf //= 2
        csize *= 2
    conv_shapes.append((cngf, n_channel))

    params = {"conv_w": [], "bn_gamma": [], "bn_beta": []}
    for cin, cout in conv_shapes:
        key, sub = jax.random.split(key)
        # Conv*: weight ~ N(0, 0.02); PyTorch ConvTranspose2d weight is (Cin, Cout, kH, kW)
        params["conv_w"].append(0.02 * jax.random.normal(sub, (cin, cout, 4, 4), jnp.float32))
    for c in bn_channels:
        key, sub = jax.random.split(key)
        # BatchNorm*: weight ~ N(1, 0.02), bias = 0
        params["bn_gamma"].append(1.0 + 0.02 * jax.random.normal(sub, (c,), jnp.float32))
        params["bn_beta"].append(jnp.zeros((c,), jnp.float32))
    return params


def generator_forward(params, z):
    w0 = params["conv_w"][0]
    z_dim = w0.shape[0]
    z2 = z.reshape(z.shape[0], z_dim).astype(jnp.float32)   # view(B, z_dim, 1, 1) + 1x1 convT
    x = conv_transpose_initial(z2, w0)                       # (N, 4, 4, cngf) bf16, NHWC
    x = pallas_batchnorm_relu(x, params["bn_gamma"][0], params["bn_beta"][0])
    n_pyramid = len(params["bn_gamma"]) - 1
    for i in range(n_pyramid):
        x = conv_transpose_s2(x, params["conv_w"][1 + i])
        x = pallas_batchnorm_relu(x, params["bn_gamma"][1 + i], params["bn_beta"][1 + i])
    x = conv_transpose_s2(x, params["conv_w"][-1], activation="tanh",
                          out_dtype=jnp.float32)             # (N, H, W, n_channel) f32
    return jnp.transpose(x, (0, 3, 1, 2))                    # NCHW, matching PyTorch


if __name__ == "__main__":
    # Small but consistent config: Generator(input_size=(16,16), n_channel=3, z_dim=8, ngf=8)
    input_size = 16
    n_channel = 3
    z_dim = 8
    ngf = 8
    batch = 2

    key = jax.random.PRNGKey(0)
    key, pkey, zkey = jax.random.split(key, 3)
    params = make_generator_params(pkey, input_size, n_channel, z_dim, ngf)
    z = jax.random.normal(zkey, (batch, z_dim, 1, 1), jnp.float32)

    fwd = jax.jit(generator_forward)
    out = jax.block_until_ready(fwd(params, z))

    assert out.shape == (batch, n_channel, input_size, input_size), out.shape
    assert out.dtype == jnp.float32
    assert bool(jnp.all(jnp.isfinite(out)))
    assert bool(jnp.all(jnp.abs(out) <= 1.0))  # tanh output range
    print("KERNEL_OK")
</pallas_src>

<mosaic_0001>
module attributes {stable_mosaic.version = 11 : i64} {
  func.func @_bn_stats_kernel(%arg0: i32, %arg1: memref<32x128xbf16, #tpu.memory_space<vmem>>, %arg2: memref<1x128xf32, #tpu.memory_space<vmem>>, %arg3: memref<1x128xf32, #tpu.memory_space<vmem>>) attributes {dimension_semantics = [#tpu.dimension_semantics<arbitrary>], iteration_bounds = array<i64: 1>, scalar_prefetch = 0 : i64, scratch_operands = 0 : i64, tpu.core_type = #tpu.core_type<tc>, window_params = [{transform_indices = @transform_0, window_bounds = array<i64: 32, 128>}, {pipeline_mode = #tpu.pipeline_mode<synchronous>, transform_indices = @transform_1, window_bounds = array<i64: 1, 128>}, {pipeline_mode = #tpu.pipeline_mode<synchronous>, transform_indices = @transform_2, window_bounds = array<i64: 1, 128>}]} {
    %c0_i32 = arith.constant 0 : i32
    %0 = arith.cmpi eq, %arg0, %c0_i32 : i32
    %1 = arith.extui %0 : i1 to i32
    %c0_i32_0 = arith.constant 0 : i32
    %2 = arith.cmpi ne, %1, %c0_i32_0 : i32
    scf.if %2 {
      %cst_11 = arith.constant 0.000000e+00 : f32
      %16 = vector.broadcast %cst_11 : f32 to vector<1x128xf32>
      %c0_12 = arith.constant 0 : index
      %c0_13 = arith.constant 0 : index
      %17 = vector.load %arg2[%c0_12, %c0_13] : memref<1x128xf32, #tpu.memory_space<vmem>>, vector<1x128xf32>
      tpu.vector_store %arg2[%c0_12, %c0_13], %16 {strides = array<i32>} : memref<1x128xf32, #tpu.memory_space<vmem>>, vector<1x128xf32>,
      %cst_14 = arith.constant 0.000000e+00 : f32
      %18 = vector.broadcast %cst_14 : f32 to vector<1x128xf32>
      %c0_15 = arith.constant 0 : index
      %c0_16 = arith.constant 0 : index
      %19 = vector.load %arg3[%c0_15, %c0_16] : memref<1x128xf32, #tpu.memory_space<vmem>>, vector<1x128xf32>
      tpu.vector_store %arg3[%c0_15, %c0_16], %18 {strides = array<i32>} : memref<1x128xf32, #tpu.memory_space<vmem>>, vector<1x128xf32>,
    } else {
    }
    %c0 = arith.constant 0 : index
    %c0_1 = arith.constant 0 : index
    %3 = vector.load %arg1[%c0, %c0_1] : memref<32x128xbf16, #tpu.memory_space<vmem>>, vector<32x128xbf16>
    %4 = arith.extf %3 : vector<32x128xbf16> to vector<32x128xf32>
    %c0_2 = arith.constant 0 : index
    %c0_3 = arith.constant 0 : index
    %5 = vector.load %arg2[%c0_2, %c0_3] : memref<1x128xf32, #tpu.memory_space<vmem>>, vector<1x128xf32>
    %cst = arith.constant dense<0.000000e+00> : vector<128xf32>
    %6 = vector.multi_reduction <add>, %4, %cst [0] : vector<32x128xf32> to vector<128xf32>
    %7 = vector.shape_cast %6 : vector<128xf32> to vector<1x128xf32>
    %8 = arith.addf %5, %7 : vector<1x128xf32>
    %c0_4 = arith.constant 0 : index
    %c0_5 = arith.constant 0 : index
    %9 = vector.load %arg2[%c0_4, %c0_5] : memref<1x128xf32, #tpu.memory_space<vmem>>, vector<1x128xf32>
    tpu.vector_store %arg2[%c0_4, %c0_5], %8 {strides = array<i32>} : memref<1x128xf32, #tpu.memory_space<vmem>>, vector<1x128xf32>,
    %c0_6 = arith.constant 0 : index
    %c0_7 = arith.constant 0 : index
    %10 = vector.load %arg3[%c0_6, %c0_7] : memref<1x128xf32, #tpu.memory_space<vmem>>, vector<1x128xf32>
    %11 = arith.mulf %4, %4 : vector<32x128xf32>
    %cst_8 = arith.constant dense<0.000000e+00> : vector<128xf32>
    %12 = vector.multi_reduction <add>, %11, %cst_8 [0] : vector<32x128xf32> to vector<128xf32>
    %13 = vector.shape_cast %12 : vector<128xf32> to vector<1x128xf32>
    %14 = arith.addf %10, %13 : vector<1x128xf32>
    %c0_9 = arith.constant 0 : index
    %c0_10 = arith.constant 0 : index
    %15 = vector.load %arg3[%c0_9, %c0_10] : memref<1x128xf32, #tpu.memory_space<vmem>>, vector<1x128xf32>
    tpu.vector_store %arg3[%c0_9, %c0_10], %14 {strides = array<i32>} : memref<1x128xf32, #tpu.memory_space<vmem>>, vector<1x128xf32>,
    return
  }
  func.func @transform_0(%arg0: i32) -> (i32, i32) {
    %c0_i32 = arith.constant 0 : i32
    %c0_i32_0 = arith.constant 0 : i32
    return %arg0, %c0_i32 : i32, i32
  }
  func.func @transform_1(%arg0: i32) -> (i32, i32) {
    %c0_i32 = arith.constant 0 : i32
    %c0_i32_0 = arith.constant 0 : i32
    %c0_i32_1 = arith.constant 0 : i32
    return %c0_i32, %c0_i32_0 : i32, i32
  }
  func.func @transform_2(%arg0: i32) -> (i32, i32) {
    %c0_i32 = arith.constant 0 : i32
    %c0_i32_0 = arith.constant 0 : i32
    %c0_i32_1 = arith.constant 0 : i32
    return %c0_i32, %c0_i32_0 : i32, i32
  }
}

module attributes {stable_mosaic.version = 11 : i64} {
  func.func @_bmm_kernel(%arg0: i32, %arg1: i32, %arg2: i32, %arg3: i32, %arg4: memref<1x16x128xbf16, #tpu.memory_space<vmem>>, %arg5: memref<1x128x256xbf16, #tpu.memory_space<vmem>>, %arg6: memref<1x16x256xbf16, #tpu.memory_space<vmem>>, %arg7: memref<16x256xf32, #tpu.memory_space<vmem>>) attributes {dimension_semantics = [#tpu.dimension_semantics<parallel>, #tpu.dimension_semantics<parallel>, #tpu.dimension_semantics<parallel>, #tpu.dimension_semantics<arbitrary>], iteration_bounds = array<i64: 1, 1, 1, 1>, scalar_prefetch = 0 : i64, scratch_operands = 1 : i64, tpu.core_type = #tpu.core_type<tc>, window_params = [{transform_indices = @transform_0, window_bounds = array<i64: 1, 16, 128>}, {transform_indices = @transform_1, window_bounds = array<i64: 1, 128, 256>}, {transform_indices = @transform_2, window_bounds = array<i64: 1, 16, 256>}]} {
    %c0_i32 = arith.constant 0 : i32
    %0 = arith.cmpi eq, %arg3, %c0_i32 : i32
    %1 = arith.extui %0 : i1 to i32
    %c0_i32_0 = arith.constant 0 : i32
    %2 = arith.cmpi ne, %1, %c0_i32_0 : i32
    scf.if %2 {
      %cst_12 = arith.constant 0.000000e+00 : f32
      %14 = vector.broadcast %cst_12 : f32 to vector<16x256xf32>
      %c0_13 = arith.constant 0 : index
      %c0_14 = arith.constant 0 : index
      %15 = vector.load %arg7[%c0_13, %c0_14] : memref<16x256xf32, #tpu.memory_space<vmem>>, vector<16x256xf32>
      tpu.vector_store %arg7[%c0_13, %c0_14], %14 {strides = array<i32>} : memref<16x256xf32, #tpu.memory_space<vmem>>, vector<16x256xf32>,
    } else {
    }
    %c0 = arith.constant 0 : index
    %c0_1 = arith.constant 0 : index
    %3 = vector.load %arg7[%c0, %c0_1] : memref<16x256xf32, #tpu.memory_space<vmem>>, vector<16x256xf32>
    %c0_2 = arith.constant 0 : index
    %c0_3 = arith.constant 0 : index
    %c0_4 = arith.constant 0 : index
    %4 = vector.load %arg4[%c0_2, %c0_3, %c0_4] : memref<1x16x128xbf16, #tpu.memory_space<vmem>>, vector<1x16x128xbf16>
    %5 = vector.shape_cast %4 : vector<1x16x128xbf16> to vector<16x128xbf16>
    %c0_5 = arith.constant 0 : index
    %c0_6 = arith.constant 0 : index
    %c0_7 = arith.constant 0 : index
    %6 = vector.load %arg5[%c0_5, %c0_6, %c0_7] : memref<1x128x256xbf16, #tpu.memory_space<vmem>>, vector<1x128x256xbf16>
    %7 = vector.shape_cast %6 : vector<1x128x256xbf16> to vector<128x256xbf16>
    %cst = arith.constant dense<0.000000e+00> : vector<16x256xf32>
    %8 = tpu.matmul %5, %7, %cst {dimension_numbers = #tpu.dot_dimension_numbers<[1], [0], [0], [1], [0, 0, 1, 1], [], []>} : vector<16x128xbf16>, vector<128x256xbf16>, vector<16x256xf32> -> vector<16x256xf32>
    %9 = arith.addf %3, %8 : vector<16x256xf32>
    %c0_8 = arith.constant 0 : index
    %c0_9 = arith.constant 0 : index
    %10 = vector.load %arg7[%c0_8, %c0_9] : memref<16x256xf32, #tpu.memory_space<vmem>>, vector<16x256xf32>
    tpu.vector_store %arg7[%c0_8, %c0_9], %9 {strides = array<i32>} : memref<16x256xf32, #tpu.memory_space<vmem>>, vector<16x256xf32>,
    %c0_i32_10 = arith.constant 0 : i32
    %11 = arith.cmpi eq, %arg3, %c0_i32_10 : i32
    %12 = arith.extui %11 : i1 to i32
    %c0_i32_11 = arith.constant 0 : i32
    %13 = arith.cmpi ne, %12, %c0_i32_11 : i32
    scf.if %13 {
      %c0_12 = arith.constant 0 : index
      %c0_13 = arith.constant 0 : index
      %14 = vector.load %arg7[%c0_12, %c0_13] : memref<16x256xf32, #tpu.memory_space<vmem>>, vector<16x256xf32>
      %15 = arith.truncf %14 : vector<16x256xf32> to vector<16x256xbf16>
      %c0_14 = arith.constant 0 : index
      %c0_15 = arith.constant 0 : index
      %c0_16 = arith.constant 0 : index
      %16 = vector.load %arg6[%c0_14, %c0_15, %c0_16] : memref<1x16x256xbf16, #tpu.memory_space<vmem>>, vector<1x16x256xbf16>
      %17 = vector.shape_cast %16 : vector<1x16x256xbf16> to vector<16x256xbf16>
      %18 = vector.shape_cast %15 : vector<16x256xbf16> to vector<1x16x256xbf16>
      tpu.vector_store %arg6[%c0_14, %c0_15, %c0_16], %18 {strides = array<i32>} : memref<1x16x256xbf16, #tpu.memory_space<vmem>>, vector<1x16x256xbf16>,
    } else {
    }
    return
  }
  func.func @transform_0(%arg0: i32, %arg1: i32, %arg2: i32, %arg3: i32) -> (i32, i32, i32) {
    %c0_i32 = arith.constant 0 : i32
    return %arg0, %arg1, %arg3 : i32, i32, i32
  }
  func.func @transform_1(%arg0: i32, %arg1: i32, %arg2: i32, %arg3: i32) -> (i32, i32, i32) {
    %c0_i32 = arith.constant 0 : i32
    return %arg0, %arg3, %arg2 : i32, i32, i32
  }
  func.func @transform_2(%arg0: i32, %arg1: i32, %arg2: i32, %arg3: i32) -> (i32, i32, i32) {
    %c0_i32 = arith.constant 0 : i32
    return %arg0, %arg1, %arg2 : i32, i32, i32
  }
}

module attributes {stable_mosaic.version = 11 : i64} {
  func.func @_bn_apply_relu_kernel(%arg0: i32, %arg1: memref<32x128xbf16, #tpu.memory_space<vmem>>, %arg2: memref<1x128xf32, #tpu.memory_space<vmem>>, %arg3: memref<1x128xf32, #tpu.memory_space<vmem>>, %arg4: memref<32x128xbf16, #tpu.memory_space<vmem>>) attributes {dimension_semantics = [#tpu.dimension_semantics<parallel>], iteration_bounds = array<i64: 1>, scalar_prefetch = 0 : i64, scratch_operands = 0 : i64, tpu.core_type = #tpu.core_type<tc>, window_params = [{transform_indices = @transform_0, window_bounds = array<i64: 32, 128>}, {pipeline_mode = #tpu.pipeline_mode<synchronous>, transform_indices = @transform_1, window_bounds = array<i64: 1, 128>}, {pipeline_mode = #tpu.pipeline_mode<synchronous>, transform_indices = @transform_2, window_bounds = array<i64: 1, 128>}, {transform_indices = @transform_3, window_bounds = array<i64: 32, 128>}]} {
    %c0 = arith.constant 0 : index
    %c0_0 = arith.constant 0 : index
    %0 = vector.load %arg1[%c0, %c0_0] : memref<32x128xbf16, #tpu.memory_space<vmem>>, vector<32x128xbf16>
    %1 = arith.extf %0 : vector<32x128xbf16> to vector<32x128xf32>
    %c0_1 = arith.constant 0 : index
    %c0_2 = arith.constant 0 : index
    %2 = vector.load %arg2[%c0_1, %c0_2] : memref<1x128xf32, #tpu.memory_space<vmem>>, vector<1x128xf32>
    %3 = vector.broadcast %2 : vector<1x128xf32> to vector<32x128xf32>
    %4 = arith.mulf %1, %3 : vector<32x128xf32>
    %c0_3 = arith.constant 0 : index
    %c0_4 = arith.constant 0 : index
    %5 = vector.load %arg3[%c0_3, %c0_4] : memref<1x128xf32, #tpu.memory_space<vmem>>, vector<1x128xf32>
    %6 = vector.broadcast %5 : vector<1x128xf32> to vector<32x128xf32>
    %7 = arith.addf %4, %6 : vector<32x128xf32>
    %cst = arith.constant 0.000000e+00 : f32
    %8 = vector.broadcast %cst : f32 to vector<32x128xf32>
    %9 = arith.maximumf %7, %8 : vector<32x128xf32>
    %10 = arith.truncf %9 : vector<32x128xf32> to vector<32x128xbf16>
    %c0_5 = arith.constant 0 : index
    %c0_6 = arith.constant 0 : index
    %11 = vector.load %arg4[%c0_5, %c0_6] : memref<32x128xbf16, #tpu.memory_space<vmem>>, vector<32x128xbf16>
    tpu.vector_store %arg4[%c0_5, %c0_6], %10 {strides = array<i32>} : memref<32x128xbf16, #tpu.memory_space<vmem>>, vector<32x128xbf16>,
    return
  }
  func.func @transform_0(%arg0: i32) -> (i32, i32) {
    %c0_i32 = arith.constant 0 : i32
    %c0_i32_0 = arith.constant 0 : i32
    return %arg0, %c0_i32 : i32, i32
  }
  func.func @transform_1(%arg0: i32) -> (i32, i32) {
    %c0_i32 = arith.constant 0 : i32
    %c0_i32_0 = arith.constant 0 : i32
    %c0_i32_1 = arith.constant 0 : i32
    return %c0_i32, %c0_i32_0 : i32, i32
  }
  func.func @transform_2(%arg0: i32) -> (i32, i32) {
    %c0_i32 = arith.constant 0 : i32
    %c0_i32_0 = arith.constant 0 : i32
    %c0_i32_1 = arith.constant 0 : i32
    return %c0_i32, %c0_i32_0 : i32, i32
  }
  func.func @transform_3(%arg0: i32) -> (i32, i32) {
    %c0_i32 = arith.constant 0 : i32
    %c0_i32_0 = arith.constant 0 : i32
    return %arg0, %c0_i32 : i32, i32
  }
}

module attributes {stable_mosaic.version = 11 : i64} {
  func.func @_bmm_kernel(%arg0: i32, %arg1: i32, %arg2: i32, %arg3: i32, %arg4: memref<1x32x128xbf16, #tpu.memory_space<vmem>>, %arg5: memref<1x128x128xbf16, #tpu.memory_space<vmem>>, %arg6: memref<1x32x128xbf16, #tpu.memory_space<vmem>>, %arg7: memref<32x128xf32, #tpu.memory_space<vmem>>) attributes {dimension_semantics = [#tpu.dimension_semantics<parallel>, #tpu.dimension_semantics<parallel>, #tpu.dimension_semantics<parallel>, #tpu.dimension_semantics<arbitrary>], iteration_bounds = array<i64: 4, 1, 1, 1>, scalar_prefetch = 0 : i64, scratch_operands = 1 : i64, tpu.core_type = #tpu.core_type<tc>, window_params = [{transform_indices = @transform_0, window_bounds = array<i64: 1, 32, 128>}, {transform_indices = @transform_1, window_bounds = array<i64: 1, 128, 128>}, {transform_indices = @transform_2, window_bounds = array<i64: 1, 32, 128>}]} {
    %c0_i32 = arith.constant 0 : i32
    %0 = arith.cmpi eq, %arg3, %c0_i32 : i32
    %1 = arith.extui %0 : i1 to i32
    %c0_i32_0 = arith.constant 0 : i32
    %2 = arith.cmpi ne, %1, %c0_i32_0 : i32
    scf.if %2 {
      %cst_12 = arith.constant 0.000000e+00 : f32
      %14 = vector.broadcast %cst_12 : f32 to vector<32x128xf32>
      %c0_13 = arith.constant 0 : index
      %c0_14 = arith.constant 0 : index
      %15 = vector.load %arg7[%c0_13, %c0_14] : memref<32x128xf32, #tpu.memory_space<vmem>>, vector<32x128xf32>
      tpu.vector_store %arg7[%c0_13, %c0_14], %14 {strides = array<i32>} : memref<32x128xf32, #tpu.memory_space<vmem>>, vector<32x128xf32>,
    } else {
    }
    %c0 = arith.constant 0 : index
    %c0_1 = arith.constant 0 : index
    %3 = vector.load %arg7[%c0, %c0_1] : memref<32x128xf32, #tpu.memory_space<vmem>>, vector<32x128xf32>
    %c0_2 = arith.constant 0 : index
    %c0_3 = arith.constant 0 : index
    %c0_4 = arith.constant 0 : index
    %4 = vector.load %arg4[%c0_2, %c0_3, %c0_4] : memref<1x32x128xbf16, #tpu.memory_space<vmem>>, vector<1x32x128xbf16>
    %5 = vector.shape_cast %4 : vector<1x32x128xbf16> to vector<32x128xbf16>
    %c0_5 = arith.constant 0 : index
    %c0_6 = arith.constant 0 : index
    %c0_7 = arith.constant 0 : index
    %6 = vector.load %arg5[%c0_5, %c0_6, %c0_7] : memref<1x128x128xbf16, #tpu.memory_space<vmem>>, vector<1x128x128xbf16>
    %7 = vector.shape_cast %6 : vector<1x128x128xbf16> to vector<128x128xbf16>
    %cst = arith.constant dense<0.000000e+00> : vector<32x128xf32>
    %8 = tpu.matmul %5, %7, %cst {dimension_numbers = #tpu.dot_dimension_numbers<[1], [0], [0], [1], [0, 0, 1, 1], [], []>} : vector<32x128xbf16>, vector<128x128xbf16>, vector<32x128xf32> -> vector<32x128xf32>
    %9 = arith.addf %3, %8 : vector<32x128xf32>
    %c0_8 = arith.constant 0 : index
    %c0_9 = arith.constant 0 : index
    %10 = vector.load %arg7[%c0_8, %c0_9] : memref<32x128xf32, #tpu.memory_space<vmem>>, vector<32x128xf32>
    tpu.vector_store %arg7[%c0_8, %c0_9], %9 {strides = array<i32>} : memref<32x128xf32, #tpu.memory_space<vmem>>, vector<32x128xf32>,
    %c0_i32_10 = arith.constant 0 : i32
    %11 = arith.cmpi eq, %arg3, %c0_i32_10 : i32
    %12 = arith.extui %11 : i1 to i32
    %c0_i32_11 = arith.constant 0 : i32
    %13 = arith.cmpi ne, %12, %c0_i32_11 : i32
    scf.if %13 {
      %c0_12 = arith.constant 0 : index
      %c0_13 = arith.constant 0 : index
      %14 = vector.load %arg7[%c0_12, %c0_13] : memref<32x128xf32, #tpu.memory_space<vmem>>, vector<32x128xf32>
      %15 = arith.truncf %14 : vector<32x128xf32> to vector<32x128xbf16>
      %c0_14 = arith.constant 0 : index
      %c0_15 = arith.constant 0 : index
      %c0_16 = arith.constant 0 : index
      %16 = vector.load %arg6[%c0_14, %c0_15, %c0_16] : memref<1x32x128xbf16, #tpu.memory_space<vmem>>, vector<1x32x128xbf16>
      %17 = vector.shape_cast %16 : vector<1x32x128xbf16> to vector<32x128xbf16>
      %18 = vector.shape_cast %15 : vector<32x128xbf16> to vector<1x32x128xbf16>
      tpu.vector_store %arg6[%c0_14, %c0_15, %c0_16], %18 {strides = array<i32>} : memref<1x32x128xbf16, #tpu.memory_space<vmem>>, vector<1x32x128xbf16>,
    } else {
    }
    return
  }
  func.func @transform_0(%arg0: i32, %arg1: i32, %arg2: i32, %arg3: i32) -> (i32, i32, i32) {
    %c0_i32 = arith.constant 0 : i32
    return %arg0, %arg1, %arg3 : i32, i32, i32
  }
  func.func @transform_1(%arg0: i32, %arg1: i32, %arg2: i32, %arg3: i32) -> (i32, i32, i32) {
    %c0_i32 = arith.constant 0 : i32
    return %arg0, %arg3, %arg2 : i32, i32, i32
  }
  func.func @transform_2(%arg0: i32, %arg1: i32, %arg2: i32, %arg3: i32) -> (i32, i32, i32) {
    %c0_i32 = arith.constant 0 : i32
    return %arg0, %arg1, %arg2 : i32, i32, i32
  }
}

module attributes {stable_mosaic.version = 11 : i64} {
  func.func @_bn_stats_kernel(%arg0: i32, %arg1: memref<128x128xbf16, #tpu.memory_space<vmem>>, %arg2: memref<1x128xf32, #tpu.memory_space<vmem>>, %arg3: memref<1x128xf32, #tpu.memory_space<vmem>>) attributes {dimension_semantics = [#tpu.dimension_semantics<arbitrary>], iteration_bounds = array<i64: 1>, scalar_prefetch = 0 : i64, scratch_operands = 0 : i64, tpu.core_type = #tpu.core_type<tc>, window_params = [{transform_indices = @transform_0, window_bounds = array<i64: 128, 128>}, {pipeline_mode = #tpu.pipeline_mode<synchronous>, transform_indices = @transform_1, window_bounds = array<i64: 1, 128>}, {pipeline_mode = #tpu.pipeline_mode<synchronous>, transform_indices = @transform_2, window_bounds = array<i64: 1, 128>}]} {
    %c0_i32 = arith.constant 0 : i32
    %0 = arith.cmpi eq, %arg0, %c0_i32 : i32
    %1 = arith.extui %0 : i1 to i32
    %c0_i32_0 = arith.constant 0 : i32
    %2 = arith.cmpi ne, %1, %c0_i32_0 : i32
    scf.if %2 {
      %cst_11 = arith.constant 0.000000e+00 : f32
      %16 = vector.broadcast %cst_11 : f32 to vector<1x128xf32>
      %c0_12 = arith.constant 0 : index
      %c0_13 = arith.constant 0 : index
      %17 = vector.load %arg2[%c0_12, %c0_13] : memref<1x128xf32, #tpu.memory_space<vmem>>, vector<1x128xf32>
      tpu.vector_store %arg2[%c0_12, %c0_13], %16 {strides = array<i32>} : memref<1x128xf32, #tpu.memory_space<vmem>>, vector<1x128xf32>,
      %cst_14 = arith.constant 0.000000e+00 : f32
      %18 = vector.broadcast %cst_14 : f32 to vector<1x128xf32>
      %c0_15 = arith.constant 0 : index
      %c0_16 = arith.constant 0 : index
      %19 = vector.load %arg3[%c0_15, %c0_16] : memref<1x128xf32, #tpu.memory_space<vmem>>, vector<1x128xf32>
      tpu.vector_store %arg3[%c0_15, %c0_16], %18 {strides = array<i32>} : memref<1x128xf32, #tpu.memory_space<vmem>>, vector<1x128xf32>,
    } else {
    }
    %c0 = arith.constant 0 : index
    %c0_1 = arith.constant 0 : index
    %3 = vector.load %arg1[%c0, %c0_1] : memref<128x128xbf16, #tpu.memory_space<vmem>>, vector<128x128xbf16>
    %4 = arith.extf %3 : vector<128x128xbf16> to vector<128x128xf32>
    %c0_2 = arith.constant 0 : index
    %c0_3 = arith.constant 0 : index
    %5 = vector.load %arg2[%c0_2, %c0_3] : memref<1x128xf32, #tpu.memory_space<vmem>>, vector<1x128xf32>
    %cst = arith.constant dense<0.000000e+00> : vector<128xf32>
    %6 = vector.multi_reduction <add>, %4, %cst [0] : vector<128x128xf32> to vector<128xf32>
    %7 = vector.shape_cast %6 : vector<128xf32> to vector<1x128xf32>
    %8 = arith.addf %5, %7 : vector<1x128xf32>
    %c0_4 = arith.constant 0 : index
    %c0_5 = arith.constant 0 : index
    %9 = vector.load %arg2[%c0_4, %c0_5] : memref<1x128xf32, #tpu.memory_space<vmem>>, vector<1x128xf32>
    tpu.vector_store %arg2[%c0_4, %c0_5], %8 {strides = array<i32>} : memref<1x128xf32, #tpu.memory_space<vmem>>, vector<1x128xf32>,
    %c0_6 = arith.constant 0 : index
    %c0_7 = arith.constant 0 : index
    %10 = vector.load %arg3[%c0_6, %c0_7] : memref<1x128xf32, #tpu.memory_space<vmem>>, vector<1x128xf32>
    %11 = arith.mulf %4, %4 : vector<128x128xf32>
    %cst_8 = arith.constant dense<0.000000e+00> : vector<128xf32>
    %12 = vector.multi_reduction <add>, %11, %cst_8 [0] : vector<128x128xf32> to vector<128xf32>
    %13 = vector.shape_cast %12 : vector<128xf32> to vector<1x128xf32>
    %14 = arith.addf %10, %13 : vector<1x128xf32>
    %c0_9 = arith.constant 0 : index
    %c0_10 = arith.constant 0 : index
    %15 = vector.load %arg3[%c0_9, %c0_10] : memref<1x128xf32, #tpu.memory_space<vmem>>, vector<1x128xf32>
    tpu.vector_store %arg3[%c0_9, %c0_10], %14 {strides = array<i32>} : memref<1x128xf32, #tpu.memory_space<vmem>>, vector<1x128xf32>,
    return
  }
  func.func @transform_0(%arg0: i32) -> (i32, i32) {
    %c0_i32 = arith.constant 0 : i32
    %c0_i32_0 = arith.constant 0 : i32
    return %arg0, %c0_i32 : i32, i32
  }
  func.func @transform_1(%arg0: i32) -> (i32, i32) {
    %c0_i32 = arith.constant 0 : i32
    %c0_i32_0 = arith.constant 0 : i32
    %c0_i32_1 = arith.constant 0 : i32
    return %c0_i32, %c0_i32_0 : i32, i32
  }
  func.func @transform_2(%arg0: i32) -> (i32, i32) {
    %c0_i32 = arith.constant 0 : i32
    %c0_i32_0 = arith.constant 0 : i32
    %c0_i32_1 = arith.constant 0 : i32
    return %c0_i32, %c0_i32_0 : i32, i32
  }
}

module attributes {stable_mosaic.version = 11 : i64} {
  func.func @_bn_apply_relu_kernel(%arg0: i32, %arg1: memref<128x128xbf16, #tpu.memory_space<vmem>>, %arg2: memref<1x128xf32, #tpu.memory_space<vmem>>, %arg3: memref<1x128xf32, #tpu.memory_space<vmem>>, %arg4: memref<128x128xbf16, #tpu.memory_space<vmem>>) attributes {dimension_semantics = [#tpu.dimension_semantics<parallel>], iteration_bounds = array<i64: 1>, scalar_prefetch = 0 : i64, scratch_operands = 0 : i64, tpu.core_type = #tpu.core_type<tc>, window_params = [{transform_indices = @transform_0, window_bounds = array<i64: 128, 128>}, {pipeline_mode = #tpu.pipeline_mode<synchronous>, transform_indices = @transform_1, window_bounds = array<i64: 1, 128>}, {pipeline_mode = #tpu.pipeline_mode<synchronous>, transform_indices = @transform_2, window_bounds = array<i64: 1, 128>}, {transform_indices = @transform_3, window_bounds = array<i64: 128, 128>}]} {
    %c0 = arith.constant 0 : index
    %c0_0 = arith.constant 0 : index
    %0 = vector.load %arg1[%c0, %c0_0] : memref<128x128xbf16, #tpu.memory_space<vmem>>, vector<128x128xbf16>
    %1 = arith.extf %0 : vector<128x128xbf16> to vector<128x128xf32>
    %c0_1 = arith.constant 0 : index
    %c0_2 = arith.constant 0 : index
    %2 = vector.load %arg2[%c0_1, %c0_2] : memref<1x128xf32, #tpu.memory_space<vmem>>, vector<1x128xf32>
    %3 = vector.broadcast %2 : vector<1x128xf32> to vector<128x128xf32>
    %4 = arith.mulf %1, %3 : vector<128x128xf32>
    %c0_3 = arith.constant 0 : index
    %c0_4 = arith.constant 0 : index
    %5 = vector.load %arg3[%c0_3, %c0_4] : memref<1x128xf32, #tpu.memory_space<vmem>>, vector<1x128xf32>
    %6 = vector.broadcast %5 : vector<1x128xf32> to vector<128x128xf32>
    %7 = arith.addf %4, %6 : vector<128x128xf32>
    %cst = arith.constant 0.000000e+00 : f32
    %8 = vector.broadcast %cst : f32 to vector<128x128xf32>
    %9 = arith.maximumf %7, %8 : vector<128x128xf32>
    %10 = arith.truncf %9 : vector<128x128xf32> to vector<128x128xbf16>
    %c0_5 = arith.constant 0 : index
    %c0_6 = arith.constant 0 : index
    %11 = vector.load %arg4[%c0_5, %c0_6] : memref<128x128xbf16, #tpu.memory_space<vmem>>, vector<128x128xbf16>
    tpu.vector_store %arg4[%c0_5, %c0_6], %10 {strides = array<i32>} : memref<128x128xbf16, #tpu.memory_space<vmem>>, vector<128x128xbf16>,
    return
  }
  func.func @transform_0(%arg0: i32) -> (i32, i32) {
    %c0_i32 = arith.constant 0 : i32
    %c0_i32_0 = arith.constant 0 : i32
    return %arg0, %c0_i32 : i32, i32
  }
  func.func @transform_1(%arg0: i32) -> (i32, i32) {
    %c0_i32 = arith.constant 0 : i32
    %c0_i32_0 = arith.constant 0 : i32
    %c0_i32_1 = arith.constant 0 : i32
    return %c0_i32, %c0_i32_0 : i32, i32
  }
  func.func @transform_2(%arg0: i32) -> (i32, i32) {
    %c0_i32 = arith.constant 0 : i32
    %c0_i32_0 = arith.constant 0 : i32
    %c0_i32_1 = arith.constant 0 : i32
    return %c0_i32, %c0_i32_0 : i32, i32
  }
  func.func @transform_3(%arg0: i32) -> (i32, i32) {
    %c0_i32 = arith.constant 0 : i32
    %c0_i32_0 = arith.constant 0 : i32
    return %arg0, %c0_i32 : i32, i32
  }
}

module attributes {stable_mosaic.version = 11 : i64} {
  func.func @_bmm_kernel(%arg0: i32, %arg1: i32, %arg2: i32, %arg3: i32, %arg4: memref<1x128x128xbf16, #tpu.memory_space<vmem>>, %arg5: memref<1x128x128xbf16, #tpu.memory_space<vmem>>, %arg6: memref<1x128x128xf32, #tpu.memory_space<vmem>>, %arg7: memref<128x128xf32, #tpu.memory_space<vmem>>) attributes {dimension_semantics = [#tpu.dimension_semantics<parallel>, #tpu.dimension_semantics<parallel>, #tpu.dimension_semantics<parallel>, #tpu.dimension_semantics<arbitrary>], iteration_bounds = array<i64: 4, 1, 1, 1>, scalar_prefetch = 0 : i64, scratch_operands = 1 : i64, tpu.core_type = #tpu.core_type<tc>, window_params = [{transform_indices = @transform_0, window_bounds = array<i64: 1, 128, 128>}, {transform_indices = @transform_1, window_bounds = array<i64: 1, 128, 128>}, {transform_indices = @transform_2, window_bounds = array<i64: 1, 128, 128>}]} {
    %c0_i32 = arith.constant 0 : i32
    %0 = arith.cmpi eq, %arg3, %c0_i32 : i32
    %1 = arith.extui %0 : i1 to i32
    %c0_i32_0 = arith.constant 0 : i32
    %2 = arith.cmpi ne, %1, %c0_i32_0 : i32
    scf.if %2 {
      %cst_12 = arith.constant 0.000000e+00 : f32
      %14 = vector.broadcast %cst_12 : f32 to vector<128x128xf32>
      %c0_13 = arith.constant 0 : index
      %c0_14 = arith.constant 0 : index
      %15 = vector.load %arg7[%c0_13, %c0_14] : memref<128x128xf32, #tpu.memory_space<vmem>>, vector<128x128xf32>
      tpu.vector_store %arg7[%c0_13, %c0_14], %14 {strides = array<i32>} : memref<128x128xf32, #tpu.memory_space<vmem>>, vector<128x128xf32>,
    } else {
    }
    %c0 = arith.constant 0 : index
    %c0_1 = arith.constant 0 : index
    %3 = vector.load %arg7[%c0, %c0_1] : memref<128x128xf32, #tpu.memory_space<vmem>>, vector<128x128xf32>
    %c0_2 = arith.constant 0 : index
    %c0_3 = arith.constant 0 : index
    %c0_4 = arith.constant 0 : index
    %4 = vector.load %arg4[%c0_2, %c0_3, %c0_4] : memref<1x128x128xbf16, #tpu.memory_space<vmem>>, vector<1x128x128xbf16>
    %5 = vector.shape_cast %4 : vector<1x128x128xbf16> to vector<128x128xbf16>
    %c0_5 = arith.constant 0 : index
    %c0_6 = arith.constant 0 : index
    %c0_7 = arith.constant 0 : index
    %6 = vector.load %arg5[%c0_5, %c0_6, %c0_7] : memref<1x128x128xbf16, #tpu.memory_space<vmem>>, vector<1x128x128xbf16>
    %7 = vector.shape_cast %6 : vector<1x128x128xbf16> to vector<128x128xbf16>
    %cst = arith.constant dense<0.000000e+00> : vector<128x128xf32>
    %8 = tpu.matmul %5, %7, %cst {dimension_numbers = #tpu.dot_dimension_numbers<[1], [0], [0], [1], [0, 0, 1, 1], [], []>} : vector<128x128xbf16>, vector<128x128xbf16>, vector<128x128xf32> -> vector<128x128xf32>
    %9 = arith.addf %3, %8 : vector<128x128xf32>
    %c0_8 = arith.constant 0 : index
    %c0_9 = arith.constant 0 : index
    %10 = vector.load %arg7[%c0_8, %c0_9] : memref<128x128xf32, #tpu.memory_space<vmem>>, vector<128x128xf32>
    tpu.vector_store %arg7[%c0_8, %c0_9], %9 {strides = array<i32>} : memref<128x128xf32, #tpu.memory_space<vmem>>, vector<128x128xf32>,
    %c0_i32_10 = arith.constant 0 : i32
    %11 = arith.cmpi eq, %arg3, %c0_i32_10 : i32
    %12 = arith.extui %11 : i1 to i32
    %c0_i32_11 = arith.constant 0 : i32
    %13 = arith.cmpi ne, %12, %c0_i32_11 : i32
    scf.if %13 {
      %c0_12 = arith.constant 0 : index
      %c0_13 = arith.constant 0 : index
      %14 = vector.load %arg7[%c0_12, %c0_13] : memref<128x128xf32, #tpu.memory_space<vmem>>, vector<128x128xf32>
      %15 = math.tanh %14 : vector<128x128xf32>
      %c0_14 = arith.constant 0 : index
      %c0_15 = arith.constant 0 : index
      %c0_16 = arith.constant 0 : index
      %16 = vector.load %arg6[%c0_14, %c0_15, %c0_16] : memref<1x128x128xf32, #tpu.memory_space<vmem>>, vector<1x128x128xf32>
      %17 = vector.shape_cast %16 : vector<1x128x128xf32> to vector<128x128xf32>
      %18 = vector.shape_cast %15 : vector<128x128xf32> to vector<1x128x128xf32>
      tpu.vector_store %arg6[%c0_14, %c0_15, %c0_16], %18 {strides = array<i32>} : memref<1x128x128xf32, #tpu.memory_space<vmem>>, vector<1x128x128xf32>,
    } else {
    }
    return
  }
  func.func @transform_0(%arg0: i32, %arg1: i32, %arg2: i32, %arg3: i32) -> (i32, i32, i32) {
    %c0_i32 = arith.constant 0 : i32
    return %arg0, %arg1, %arg3 : i32, i32, i32
  }
  func.func @transform_1(%arg0: i32, %arg1: i32, %arg2: i32, %arg3: i32) -> (i32, i32, i32) {
    %c0_i32 = arith.constant 0 : i32
    return %arg0, %arg3, %arg2 : i32, i32, i32
  }
  func.func @transform_2(%arg0: i32, %arg1: i32, %arg2: i32, %arg3: i32) -> (i32, i32, i32) {
    %c0_i32 = arith.constant 0 : i32
    return %arg0, %arg1, %arg2 : i32, i32, i32
  }
}

</mosaic_0001>

<bundles_post_ra>
// kernel: generator_forward.8
= control target key start
LH: loop header
LB: loop body
LE: loop exit
PB: predicated region body
PF: predicated region fallthrough
CT: control target
= control target key end

     0   :  { %v70_v0 = vmov 0.0   ;;  %s110_s1 = inlined_call_operand.vmem [shape: f32[1,128], index: 1, kind: output, shape index: {0}]   ;;  %s111_s2 = inlined_call_operand.vmem [shape: f32[1,128], index: 2, kind: output, shape index: {1}]   ;;  %s112_s0 = inlined_call_operand.vmem [shape: bf16[32,128], index: 0, kind: input, shape index: {}]  }
   0x1   :  { %14 = vst [vmem:[%s110_s1] sm:$0x1] %v70_v0  ;;  %15 = vst [vmem:[%s111_s2] sm:$0x1] %v70_v0  ;;  %v61_v1 = vld [vmem:[%s112_s0] sm:$0xff]   ;;  %v68_v2 = vld [vmem:[%s112_s0 + $0x8] sm:$0xff]  }
   0x2   :  { %v62_v3 = vunpack.c.l.bf16 %v61_v1  ;;  %v63_v4 = vunpack.c.h.bf16 %v61_v1  ;;  %v66_v5 = vunpack.c.l.bf16 %v68_v2  ;;  %v67_v6 = vunpack.c.h.bf16 %v68_v2 }
   0x4   :  { %v25_v7 = vadd.f32 %v63_v4, %v62_v3  ;;  %v37_v8 = vmul.f32 %v62_v3, %v62_v3  ;;  %v38_v9 = vmul.f32 %v63_v4, %v63_v4  ;;  %v39_v10 = vmul.f32 %v66_v5, %v66_v5 }
   0x5   :  { %v40_v12 = vmul.f32 %v67_v6, %v67_v6 }
   0x6   :  { %v26_v11 = vadd.f32 %v66_v5, %v25_v7  ;;  %v41_v13 = vadd.f32 %v38_v9, %v37_v8 }
   0x8   :  { %v27_v14 = vadd.f32 %v67_v6, %v26_v11  ;;  %v42_v15 = vadd.f32 %v41_v13, %v39_v10  ;;  %v24_v26 = vld [vmem:[%s110_s1] sm:$0x1] }
   0x9   :  { %v36_v29 = vld [vmem:[%s111_s2] sm:$0x1] }
   0xa   :  { %v28_v16 = vrot.slane %v27_v14, 4  ;;  %v43_v17 = vadd.f32 %v42_v15, %v40_v12 }
   0xc   :  { %v29_v18 = vadd.f32 %v28_v16, %v27_v14  ;;  %v44_v19 = vrot.slane %v43_v17, 4 }
   0xe   :  { %v30_v20 = vrot.slane %v29_v18, 2  ;;  %v45_v21 = vadd.f32 %v44_v19, %v43_v17 }
  0x10   :  { %v31_v22 = vadd.f32 %v30_v20, %v29_v18  ;;  %v46_v23 = vrot.slane %v45_v21, 2 }
  0x12   :  { %v32_v24 = vrot.slane %v31_v22, 1  ;;  %v47_v25 = vadd.f32 %v46_v23, %v45_v21 }
  0x14   :  { %v33_v27 = vadd.f32 %v32_v24, %v31_v22  ;;  %v48_v28 = vrot.slane %v47_v25, 1 }
  0x16   :  { %v34_v30 = vadd.f32 %v33_v27, %v24_v26  ;;  %v49_v31 = vadd.f32 %v48_v28, %v47_v25 }
  0x18   :  { %35 = vst [vmem:[%s110_s1] sm:$0x1] %v34_v30  ;;  %v50_v32 = vadd.f32 %v49_v31, %v36_v29 }
  0x1a   :  { %51 = vst [vmem:[%s111_s2] sm:$0x1] %v50_v32 }

// kernel: generator_forward.9
= control target key start
LH: loop header
LB: loop body
LE: loop exit
PB: predicated region body
PF: predicated region fallthrough
CT: control target
= control target key end

     0   :  { %s140_s0 = inlined_call_operand.vmem [shape: bf16[32,128], index: 0, kind: input, shape index: {}]   ;;  %s141_s1 = inlined_call_operand.vmem [shape: f32[1,128], index: 1, kind: input, shape index: {}]   ;;  %s142_s2 = inlined_call_operand.vmem [shape: f32[1,128], index: 2, kind: input, shape index: {}]   ;;  %s143_s3 = inlined_call_operand.vmem [shape: bf16[32,128], index: 3, kind: output, shape index: {}]  }
   0x1   :  { %v83_v0 = vld [vmem:[%s140_s0] sm:$0xff]   ;;  %v100_v4 = vld [vmem:[%s140_s0 + $0x8] sm:$0xff]  }
   0x2   :  { %v72_v1 = vld [vmem:[%s141_s1] ss:$0 sm:$0xff]  ;;  %v84_v2 = vunpack.c.l.bf16 %v83_v0  ;;  %v85_v3 = vunpack.c.h.bf16 %v83_v0  ;;  %v88_v6 = vunpack.c.l.bf16 %v100_v4  ;;  %v89_v7 = vunpack.c.h.bf16 %v100_v4 }
   0x3   :  { %v73_v5 = vld [vmem:[%s142_s2] ss:$0 sm:$0xff] }
   0x4   :  { %v29_v8 = vmul.f32 %v84_v2, %v72_v1  ;;  %v30_v9 = vmul.f32 %v85_v3, %v72_v1  ;;  %v31_v10 = vmul.f32 %v88_v6, %v72_v1  ;;  %v32_v11 = vmul.f32 %v89_v7, %v72_v1 }
   0x6   :  { %v40_v12 = vadd.f32 %v73_v5, %v29_v8  ;;  %v41_v13 = vadd.f32 %v73_v5, %v30_v9  ;;  %v42_v14 = vadd.f32 %v73_v5, %v31_v10  ;;  %v43_v15 = vadd.f32 %v73_v5, %v32_v11 }
   0x8   :  { %v44_v16 = vmax.f32 %v40_v12, 0.0  ;;  %v45_v17 = vmax.f32 %v41_v13, 0.0  ;;  %v46_v18 = vmax.f32 %v42_v14, 0.0  ;;  %v47_v19 = vmax.f32 %v43_v15, 0.0 }
   0xa   :  { %v93_v20 = vpack.c.bf16 %v45_v17, %v44_v16  ;;  %v98_v21 = vpack.c.bf16 %v47_v19, %v46_v18 }
   0xc   :  { %94 = vst [vmem:[%s143_s3] sm:$0xff] %v93_v20   ;;  %101 = vst [vmem:[%s143_s3 + $0x8] sm:$0xff] %v98_v21  }

// kernel: generator_forward.7
= control target key start
LH: loop header
LB: loop body
LE: loop exit
PB: predicated region body
PF: predicated region fallthrough
CT: control target
= control target key end

     0   :  { %v251_v1 = vmov 0   ;;  %s324_s1 = inlined_call_operand.vmem [shape: bf16[1,128,256], index: 1, kind: input, shape index: {}]   ;;  %s325_s0 = inlined_call_operand.vmem [shape: bf16[1,16,128], index: 0, kind: input, shape index: {}]   ;;  %s326_s2 = inlined_call_operand.vmem [shape: bf16[1,16,256], index: 2, kind: output, shape index: {}]  }
   0x1   :  { %v226_v0 = vld [vmem:[%s324_s1 + $0x74] ss:$8 sps:$4 sm:$0xff]   ;;  %160 = vmatprep.mubr.bf16.mxu0 %v251_v1  ;;  %v228_v2 = vld [vmem:[%s324_s1 + $0x70] ss:$8 sps:$4 sm:$0xff]   ;;  %v229_v3 = vld [vmem:[%s324_s1 + $0x64] ss:$8 sps:$4 sm:$0xff]  }
   0x2   :  { %128 = vmatprep.subr.bf16.mxu0 %v226_v0  ;;  %v231_v4 = vld [vmem:[%s324_s1 + $0x60] ss:$8 sps:$4 sm:$0xff]   ;;  %v232_v5 = vld [vmem:[%s324_s1 + $0x54] ss:$8 sps:$4 sm:$0xff]   ;;  %v234_v6 = vld [vmem:[%s324_s1 + $0x50] ss:$8 sps:$4 sm:$0xff]  }
   0x3   :  { %129 = vmatpush1.bf16.msra.mxu0 %v228_v2  ;;  %v235_v7 = vld [vmem:[%s324_s1 + $0x44] ss:$8 sps:$4 sm:$0xff]   ;;  %v237_v8 = vld [vmem:[%s324_s1 + $0x40] ss:$8 sps:$4 sm:$0xff]   ;;  %v238_v9 = vld [vmem:[%s324_s1 + $0x34] ss:$8 sps:$4 sm:$0xff]  }
   0x4   :  { %130 = vmatprep.subr.bf16.mxu0 %v229_v3  ;;  %v240_v10 = vld [vmem:[%s324_s1 + $0x30] ss:$8 sps:$4 sm:$0xff]   ;;  %v241_v11 = vld [vmem:[%s324_s1 + $0x24] ss:$8 sps:$4 sm:$0xff]   ;;  %v243_v12 = vld [vmem:[%s324_s1 + $0x20] ss:$8 sps:$4 sm:$0xff]  }
   0x5   :  { %v244_v13 = vld [vmem:[%s324_s1 + $0x14] ss:$8 sps:$4 sm:$0xff]   ;;  %v246_v14 = vld [vmem:[%s324_s1 + $0x10] ss:$8 sps:$4 sm:$0xff]   ;;  %v247_v15 = vld [vmem:[%s324_s1 + $0x4] ss:$8 sps:$4 sm:$0xff]  }
   0x6   :  { %v249_v16 = vld [vmem:[%s324_s1] ss:$8 sps:$4 sm:$0xff]  }
   0x7   :  { %131 = vmatpush1.bf16.msra.mxu0 %v231_v4  ;;  %v250_v17 = vld [vmem:[%s325_s0] sm:$0xff]  }
   0x8   :  { %132 = vmatprep.subr.bf16.mxu0 %v232_v5 }
   0xb   :  { %133 = vmatpush1.bf16.msra.mxu0 %v234_v6 }
   0xc   :  { %134 = vmatprep.subr.bf16.mxu0 %v235_v7 }
   0xf   :  { %135 = vmatpush1.bf16.msra.mxu0 %v237_v8 }
  0x10   :  { %136 = vmatprep.subr.bf16.mxu0 %v238_v9 }
  0x13   :  { %137 = vmatpush1.bf16.msra.mxu0 %v240_v10 }
  0x14   :  { %138 = vmatprep.subr.bf16.mxu0 %v241_v11 }
  0x17   :  { %139 = vmatpush1.bf16.msra.mxu0 %v243_v12 }
  0x18   :  { %140 = vmatprep.subr.bf16.mxu0 %v244_v13 }
  0x1b   :  { %141 = vmatpush1.bf16.msra.mxu0 %v246_v14 }
  0x1c   :  { %142 = vmatprep.subr.bf16.mxu0 %v247_v15 }
  0x1f   :  { %143 = vmatpush1.bf16.msra.mxu0 %v249_v16 }
  0x22   :  { %161 = vmatmul.mubr.bf16.vlgmr.msra.gmra.mxu0 %v250_v17 }
  0xe2   :  { %v162_v18 = vpop.f32.mrf.mxu0 }
  0xe4   :  { %v164_v19 = vpop.f32.mrf.mxu0 }
  0xe5   :  { %v223_v20 = vpack.c.bf16 %v164_v19, %v162_v18 }
  0xe6   :  { %v166_v21 = vpop.f32.mrf.mxu0 }
  0xe7   :  { %198 = vst [vmem:[%s326_s2] sm:$0xff] %v223_v20 }
  0xe8   :  { %v168_v22 = vpop.f32.mrf.mxu0 }
  0xe9   :  { %v224_v23 = vpack.c.bf16 %v168_v22, %v166_v21 }
  0xeb   :  { %199 = vst [vmem:[%s326_s2 + $0x8] sm:$0xff] %v224_v23 }

// kernel: generator_forward.11
= control target key start
LH: loop header
LB: loop body
LE: loop exit
PB: predicated region body
PF: predicated region fallthrough
CT: control target
= control target key end

     0   :  { %v160_v0 = vmov 0.0   ;;  %s218_s1 = inlined_call_operand.vmem [shape: f32[1,128], index: 1, kind: output, shape index: {0}]   ;;  %s219_s2 = inlined_call_operand.vmem [shape: f32[1,128], index: 2, kind: output, shape index: {1}]   ;;  %s220_s0 = inlined_call_operand.vmem [shape: bf16[128,128], index: 0, kind: input, shape index: {}]  }
   0x1   :  { %14 = vst [vmem:[%s218_s1] sm:$0x1] %v160_v0  ;;  %15 = vst [vmem:[%s219_s2] sm:$0x1] %v160_v0  ;;  %v121_v1 = vld [vmem:[%s220_s0] sm:$0xff]   ;;  %v152_v2 = vld [vmem:[%s220_s0 + $0x8] sm:$0xff]  }
   0x2   :  { %v122_v3 = vunpack.c.l.bf16 %v121_v1  ;;  %v123_v4 = vunpack.c.h.bf16 %v121_v1  ;;  %v126_v5 = vunpack.c.l.bf16 %v152_v2  ;;  %v153_v6 = vld [vmem:[%s220_s0 + $0x10] sm:$0xff]   ;;  %v127_v7 = vunpack.c.h.bf16 %v152_v2  ;;  %v154_v14 = vld [vmem:[%s220_s0 + $0x18] sm:$0xff]   ;;  %v155_v23 = vld [vmem:[%s220_s0 + $0x20] sm:$0xff]  }
   0x3   :  { %v130_v11 = vunpack.c.l.bf16 %v153_v6  ;;  %v131_v15 = vunpack.c.h.bf16 %v153_v6  ;;  %v134_v19 = vunpack.c.l.bf16 %v154_v14  ;;  %v135_v24 = vunpack.c.h.bf16 %v154_v14  ;;  %v156_v32 = vld [vmem:[%s220_s0 + $0x28] sm:$0xff]   ;;  %v157_v41 = vld [vmem:[%s220_s0 + $0x30] sm:$0xff]   ;;  %v158_v50 = vld [vmem:[%s220_s0 + $0x38] sm:$0xff]  }
   0x4   :  { %v49_v8 = vadd.f32 %v123_v4, %v122_v3  ;;  %v73_v9 = vmul.f32 %v122_v3, %v122_v3  ;;  %v74_v10 = vmul.f32 %v123_v4, %v123_v4  ;;  %v75_v13 = vmul.f32 %v126_v5, %v126_v5 }
   0x5   :  { %v76_v17 = vmul.f32 %v127_v7, %v127_v7  ;;  %v77_v21 = vmul.f32 %v130_v11, %v130_v11  ;;  %v78_v26 = vmul.f32 %v131_v15, %v131_v15  ;;  %v138_v28 = vunpack.c.l.bf16 %v155_v23 }
   0x6   :  { %v50_v12 = vadd.f32 %v126_v5, %v49_v8  ;;  %v89_v18 = vadd.f32 %v74_v10, %v73_v9  ;;  %v79_v30 = vmul.f32 %v134_v19, %v134_v19  ;;  %v139_v33 = vunpack.c.h.bf16 %v155_v23 }
   0x7   :  { %v80_v35 = vmul.f32 %v135_v24, %v135_v24  ;;  %v142_v37 = vunpack.c.l.bf16 %v156_v32  ;;  %v81_v39 = vmul.f32 %v138_v28, %v138_v28  ;;  %v143_v42 = vunpack.c.h.bf16 %v156_v32 }
   0x8   :  { %v51_v16 = vadd.f32 %v127_v7, %v50_v12  ;;  %v90_v22 = vadd.f32 %v89_v18, %v75_v13  ;;  %v82_v44 = vmul.f32 %v139_v33, %v139_v33  ;;  %v146_v46 = vunpack.c.l.bf16 %v157_v41 }
   0x9   :  { %v83_v48 = vmul.f32 %v142_v37, %v142_v37  ;;  %v147_v51 = vunpack.c.h.bf16 %v157_v41  ;;  %v84_v53 = vmul.f32 %v143_v42, %v143_v42  ;;  %v150_v55 = vunpack.c.l.bf16 %v158_v50 }
   0xa   :  { %v52_v20 = vadd.f32 %v130_v11, %v51_v16  ;;  %v91_v27 = vadd.f32 %v90_v22, %v76_v17  ;;  %v85_v57 = vmul.f32 %v146_v46, %v146_v46  ;;  %v151_v59 = vunpack.c.h.bf16 %v158_v50 }
   0xb   :  { %v86_v61 = vmul.f32 %v147_v51, %v147_v51  ;;  %v87_v0 = vmul.f32 %v150_v55, %v150_v55 }
   0xc   :  { %v53_v25 = vadd.f32 %v131_v15, %v52_v20  ;;  %v92_v31 = vadd.f32 %v91_v27, %v77_v21  ;;  %v88_v3 = vmul.f32 %v151_v59, %v151_v59  ;;  %v48_v15 = vld [vmem:[%s218_s1] sm:$0x1] }
   0xd   :  { %v72_v20 = vld [vmem:[%s219_s2] sm:$0x1] }
   0xe   :  { %v54_v29 = vadd.f32 %v134_v19, %v53_v25  ;;  %v93_v36 = vadd.f32 %v92_v31, %v78_v26 }
  0x10   :  { %v55_v34 = vadd.f32 %v135_v24, %v54_v29  ;;  %v94_v40 = vadd.f32 %v93_v36, %v79_v30 }
  0x12   :  { %v56_v38 = vadd.f32 %v138_v28, %v55_v34  ;;  %v95_v45 = vadd.f32 %v94_v40, %v80_v35 }
  0x14   :  { %v57_v43 = vadd.f32 %v139_v33, %v56_v38  ;;  %v96_v49 = vadd.f32 %v95_v45, %v81_v39 }
  0x16   :  { %v58_v47 = vadd.f32 %v142_v37, %v57_v43  ;;  %v97_v54 = vadd.f32 %v96_v49, %v82_v44 }
  0x18   :  { %v59_v52 = vadd.f32 %v143_v42, %v58_v47  ;;  %v98_v58 = vadd.f32 %v97_v54, %v83_v48 }
  0x1a   :  { %v60_v56 = vadd.f32 %v146_v46, %v59_v52  ;;  %v99_v62 = vadd.f32 %v98_v58, %v84_v53 }
  0x1c   :  { %v61_v60 = vadd.f32 %v147_v51, %v60_v56  ;;  %v100_v1 = vadd.f32 %v99_v62, %v85_v57 }
  0x1e   :  { %v62_v63 = vadd.f32 %v150_v55, %v61_v60  ;;  %v101_v4 = vadd.f32 %v100_v1, %v86_v61 }
  0x20   :  { %v63_v2 = vadd.f32 %v151_v59, %v62_v63  ;;  %v102_v6 = vadd.f32 %v101_v4, %v87_v0 }
  0x22   :  { %v64_v5 = vrot.slane %v63_v2, 4  ;;  %v103_v8 = vadd.f32 %v102_v6, %v88_v3 }
  0x24   :  { %v65_v7 = vadd.f32 %v64_v5, %v63_v2  ;;  %v104_v10 = vrot.slane %v103_v8, 4 }
  0x26   :  { %v66_v9 = vrot.slane %v65_v7, 2  ;;  %v105_v12 = vadd.f32 %v104_v10, %v103_v8 }
  0x28   :  { %v67_v11 = vadd.f32 %v66_v9, %v65_v7  ;;  %v106_v14 = vrot.slane %v105_v12, 2 }
  0x2a   :  { %v68_v13 = vrot.slane %v67_v11, 1  ;;  %v107_v17 = vadd.f32 %v106_v14, %v105_v12 }
  0x2c   :  { %v69_v16 = vadd.f32 %v68_v13, %v67_v11  ;;  %v108_v19 = vrot.slane %v107_v17, 1 }
  0x2e   :  { %v70_v18 = vadd.f32 %v69_v16, %v48_v15  ;;  %v109_v21 = vadd.f32 %v108_v19, %v107_v17 }
  0x30   :  { %71 = vst [vmem:[%s218_s1] sm:$0x1] %v70_v18  ;;  %v110_v22 = vadd.f32 %v109_v21, %v72_v20 }
  0x32   :  { %111 = vst [vmem:[%s219_s2] sm:$0x1] %v110_v22 }

// kernel: generator_forward.10
= control target key start
LH: loop header
LB: loop body
LE: loop exit
PB: predicated region body
PF: predicated region fallthrough
CT: control target
= control target key end

     0   :  { %s715_s9 = smov 0   ;;  %s717_s10 = smov 0   ;;  %s759_s0 = inlined_call_operand.vmem [shape: bf16[4,32,128], index: 0, kind: input, shape index: {}]   ;;  %s760_s1 = inlined_call_operand.vmem [shape: bf16[4,128,128], index: 1, kind: input, shape index: {}]   ;;  %s761_s2 = inlined_call_operand.vmem [shape: bf16[4,32,128], index: 2, kind: output, shape index: {}]  }
   0x1   :  { %s719_s11 = smov 0  }
   0x2 LB: > { %s38_s12 = sadd.s32 1, %s694_s10  ;;  %p571_p0 = scmp.ge.s32.totalorder %s698_s11, 1  ;;  %s698_s11 = sphi %s719_s11, %s12_s11   ;;  %s694_s10 = sphi %s717_s10, %s763_s10   ;;  %s690_s9 = sphi %s715_s9, %s762_s9  }
   0x3   : > { %p40_p1 = scmp.ge.s32.totalorder %s38_s12, 4  ;;  %p176_p2 = scmp.lt.s32.totalorder %s698_s11, 5 }
   0x5   : > { %s765_s12 = smov (%p40_p1, %s38_s12), 0  ;;  %p177_p3 = pnand %p571_p0, %p176_p2 }
   0x6   : > { %p225_p4 = scmp.lt.s32.totalorder (!%p177_p3), %s690_s9, 3 }
   0x7   : > { %180 = sbr.rel (%p177_p3) target bundleno = 250 (0xfa), region = 28 }
   0xc   : > { %s767_s9 = smov (!%p225_p4, %s690_s9), 3 }
   0xd   : > { %s595_s13 = sshll.u32 %s767_s9, 6  ;;  %s594_s17 = sshll.u32 %s767_s9, 4 }
   0xe   : > { %s248_s16 = scalar_lea.vmem %s760_s1, %s595_s13  ;;  %s235_s20 = scalar_lea.vmem %s759_s0, %s594_s17 }
   0xf   : > { %v666_v0 = vld [vmem:[%s248_s16 + $0x38] sm:$0xff]   ;;  %v667_v1 = vld [vmem:[%s248_s16 + $0x30] sm:$0xff]   ;;  %v668_v2 = vld [vmem:[%s248_s16 + $0x28] sm:$0xff]   ;;  %s261_s23 = scalar_lea.vmem %s761_s2, %s594_s17 }
  0x10   : > { %622 = vmatprep.subr.bf16.mxu0 %v666_v0  ;;  %v669_v3 = vld [vmem:[%s248_s16 + $0x20] sm:$0xff]   ;;  %v670_v5 = vld [vmem:[%s248_s16 + $0x18] sm:$0xff]   ;;  %v671_v6 = vld [vmem:[%s248_s16 + $0x10] sm:$0xff]  }
  0x11   : > { %623 = vmatpush3.bf16.msra.mxu0 %v666_v0  ;;  %v674_v4 = vld [vmem:[%s235_s20] sm:$0xff]   ;;  %v672_v7 = vld [vmem:[%s248_s16 + $0x8] sm:$0xff]  }
  0x12   : > { %624 = vmatprep.subr.bf16.mxu0 %v667_v1  ;;  %638 = vmatprep.mubr.bf16.mxu0 %v674_v4  ;;  %v673_v8 = vld [vmem:[%s248_s16] sm:$0xff]   ;;  %v675_v9 = vld [vmem:[%s235_s20 + $0x8] sm:$0xff]  }
  0x15   : > { %625 = vmatpush3.bf16.msra.mxu0 %v667_v1 }
  0x16   : > { %626 = vmatprep.subr.bf16.mxu0 %v668_v2 }
  0x19   : > { %627 = vmatpush3.bf16.msra.mxu0 %v668_v2 }
  0x1a   : > { %628 = vmatprep.subr.bf16.mxu0 %v669_v3 }
  0x1d   : > { %629 = vmatpush3.bf16.msra.mxu0 %v669_v3 }
  0x1e   : > { %630 = vmatprep.subr.bf16.mxu0 %v670_v5 }
  0x21   : > { %631 = vmatpush3.bf16.msra.mxu0 %v670_v5 }
  0x22   : > { %632 = vmatprep.subr.bf16.mxu0 %v671_v6 }
  0x25   : > { %633 = vmatpush3.bf16.msra.mxu0 %v671_v6 }
  0x26   : > { %634 = vmatprep.subr.bf16.mxu0 %v672_v7 }
  0x29   : > { %635 = vmatpush3.bf16.msra.mxu0 %v672_v7 }
  0x2a   : > { %636 = vmatprep.subr.bf16.mxu0 %v673_v8 }
  0x2d   : > { %637 = vmatpush3.bf16.msra.mxu0 %v673_v8 }
  0x30   : > { %639 = vmatmul.mubr.bf16.vlgmr.msra.gmra.mxu0 %v675_v9 }
  0xf0   : > { %v640_v10 = vpop.f32.mrf.mxu0 }
  0xf2   : > { %v390_v11 = vpop.f32.mrf.mxu0 }
  0xf4   : > { %v641_v12 = vpop.f32.mrf.mxu0 }
  0xf5   : > { %v609_v13 = vpack.c.bf16 %v641_v12, %v640_v10 }
  0xf6   : > { %v393_v14 = vpop.f32.mrf.mxu0 }
  0xf7   : > { %611 = vst [vmem:[%s261_s23 + $0x8] sm:$0xff] %v609_v13   ;;  %v604_v15 = vpack.c.bf16 %v393_v14, %v390_v11 }
  0xf9   : > { %605 = vst [vmem:[%s261_s23] sm:$0xff] %v604_v15  }
  0xfa PF: > { %s12_s11 = sadd.s32 1, %s698_s11   ;;  %s762_s9 = smov %s694_s10 }
  0xfb   : > { %p9_p5 = scmp.ge.s32.totalorder %s12_s11, 6   ;;  %s763_s10 = smov %s765_s12 }
  0xfd   :  { %11 = sbr.rel (!%p9_p5) target bundleno = 2 (0x2), region = 69 }

// kernel: generator_forward.12
= control target key start
LH: loop header
LB: loop body
LE: loop exit
PB: predicated region body
PF: predicated region fallthrough
CT: control target
= control target key end

     0   :  { %s422_s0 = inlined_call_operand.vmem [shape: bf16[128,128], index: 0, kind: input, shape index: {}]   ;;  %s423_s1 = inlined_call_operand.vmem [shape: f32[1,128], index: 1, kind: input, shape index: {}]   ;;  %s424_s2 = inlined_call_operand.vmem [shape: f32[1,128], index: 2, kind: input, shape index: {}]   ;;  %s425_s3 = inlined_call_operand.vmem [shape: bf16[128,128], index: 3, kind: output, shape index: {}]  }
   0x1   :  { %v227_v0 = vld [vmem:[%s422_s0] sm:$0xff]   ;;  %v298_v4 = vld [vmem:[%s422_s0 + $0x8] sm:$0xff]   ;;  %v299_v5 = vld [vmem:[%s422_s0 + $0x10] sm:$0xff]  }
   0x2   :  { %v338_v1 = vld [vmem:[%s423_s1] ss:$0 sm:$0xff]  ;;  %v228_v2 = vunpack.c.l.bf16 %v227_v0  ;;  %v229_v3 = vunpack.c.h.bf16 %v227_v0  ;;  %v300_v6 = vld [vmem:[%s422_s0 + $0x18] sm:$0xff]   ;;  %v232_v8 = vunpack.c.l.bf16 %v298_v4  ;;  %v233_v9 = vunpack.c.h.bf16 %v298_v4  ;;  %v302_v33 = vld [vmem:[%s422_s0 + $0x28] sm:$0xff]  }
   0x3   :  { %v352_v7 = vld [vmem:[%s424_s2] ss:$0 sm:$0xff]  ;;  %v236_v10 = vunpack.c.l.bf16 %v299_v5  ;;  %v237_v11 = vunpack.c.h.bf16 %v299_v5  ;;  %v240_v14 = vunpack.c.l.bf16 %v300_v6  ;;  %v241_v15 = vunpack.c.h.bf16 %v300_v6  ;;  %v303_v38 = vld [vmem:[%s422_s0 + $0x30] sm:$0xff]   ;;  %v304_v43 = vld [vmem:[%s422_s0 + $0x38] sm:$0xff]  }
   0x4   :  { %v53_v12 = vmul.f32 %v228_v2, %v338_v1  ;;  %v54_v13 = vmul.f32 %v229_v3, %v338_v1  ;;  %v55_v16 = vmul.f32 %v232_v8, %v338_v1  ;;  %v56_v17 = vmul.f32 %v233_v9, %v338_v1  ;;  %v301_v28 = vld [vmem:[%s422_s0 + $0x20] sm:$0xff]  }
   0x5   :  { %v57_v18 = vmul.f32 %v236_v10, %v338_v1  ;;  %v58_v19 = vmul.f32 %v237_v11, %v338_v1  ;;  %v59_v22 = vmul.f32 %v240_v14, %v338_v1  ;;  %v60_v23 = vmul.f32 %v241_v15, %v338_v1 }
   0x6   :  { %v76_v20 = vadd.f32 %v352_v7, %v53_v12  ;;  %v77_v21 = vadd.f32 %v352_v7, %v54_v13  ;;  %v78_v24 = vadd.f32 %v352_v7, %v55_v16  ;;  %v79_v25 = vadd.f32 %v352_v7, %v56_v17 }
   0x7   :  { %v80_v26 = vadd.f32 %v352_v7, %v57_v18  ;;  %v81_v27 = vadd.f32 %v352_v7, %v58_v19  ;;  %v82_v31 = vadd.f32 %v352_v7, %v59_v22  ;;  %v83_v32 = vadd.f32 %v352_v7, %v60_v23 }
   0x8   :  { %v92_v29 = vmax.f32 %v76_v20, 0.0  ;;  %v93_v30 = vmax.f32 %v77_v21, 0.0  ;;  %v94_v34 = vmax.f32 %v78_v24, 0.0  ;;  %v95_v35 = vmax.f32 %v79_v25, 0.0 }
   0x9   :  { %v96_v36 = vmax.f32 %v80_v26, 0.0  ;;  %v97_v37 = vmax.f32 %v81_v27, 0.0  ;;  %v98_v40 = vmax.f32 %v82_v31, 0.0  ;;  %v99_v41 = vmax.f32 %v83_v32, 0.0 }
   0xa   :  { %v261_v39 = vpack.c.bf16 %v93_v30, %v92_v29  ;;  %v244_v42 = vunpack.c.l.bf16 %v301_v28  ;;  %v266_v44 = vpack.c.bf16 %v95_v35, %v94_v34  ;;  %v245_v46 = vunpack.c.h.bf16 %v301_v28 }
   0xb   :  { %v271_v45 = vpack.c.bf16 %v97_v37, %v96_v36  ;;  %v248_v47 = vunpack.c.l.bf16 %v302_v33  ;;  %v276_v48 = vpack.c.bf16 %v99_v41, %v98_v40  ;;  %v249_v50 = vunpack.c.h.bf16 %v302_v33 }
   0xc   :  { %262 = vst [vmem:[%s425_s3] sm:$0xff] %v261_v39   ;;  %v61_v49 = vmul.f32 %v244_v42, %v338_v1  ;;  %v252_v51 = vunpack.c.l.bf16 %v303_v38  ;;  %305 = vst [vmem:[%s425_s3 + $0x8] sm:$0xff] %v266_v44   ;;  %v62_v52 = vmul.f32 %v245_v46, %v338_v1  ;;  %v253_v54 = vunpack.c.h.bf16 %v303_v38 }
   0xd   :  { %306 = vst [vmem:[%s425_s3 + $0x10] sm:$0xff] %v271_v45   ;;  %v63_v53 = vmul.f32 %v248_v47, %v338_v1  ;;  %v256_v55 = vunpack.c.l.bf16 %v304_v43  ;;  %307 = vst [vmem:[%s425_s3 + $0x18] sm:$0xff] %v276_v48   ;;  %v64_v57 = vmul.f32 %v249_v50, %v338_v1  ;;  %v257_v59 = vunpack.c.h.bf16 %v304_v43 }
   0xe   :  { %v84_v56 = vadd.f32 %v352_v7, %v61_v49  ;;  %v65_v58 = vmul.f32 %v252_v51, %v338_v1  ;;  %v85_v60 = vadd.f32 %v352_v7, %v62_v52  ;;  %v66_v62 = vmul.f32 %v253_v54, %v338_v1 }
   0xf   :  { %v86_v61 = vadd.f32 %v352_v7, %v63_v53  ;;  %v67_v63 = vmul.f32 %v256_v55, %v338_v1  ;;  %v87_v2 = vadd.f32 %v352_v7, %v64_v57  ;;  %v68_v4 = vmul.f32 %v257_v59, %v338_v1 }
  0x10   :  { %v100_v0 = vmax.f32 %v84_v56, 0.0  ;;  %v88_v3 = vadd.f32 %v352_v7, %v65_v58  ;;  %v101_v5 = vmax.f32 %v85_v60, 0.0  ;;  %v89_v8 = vadd.f32 %v352_v7, %v66_v62 }
  0x11   :  { %v102_v6 = vmax.f32 %v86_v61, 0.0  ;;  %v90_v9 = vadd.f32 %v352_v7, %v67_v63  ;;  %v103_v10 = vmax.f32 %v87_v2, 0.0  ;;  %v91_v12 = vadd.f32 %v352_v7, %v68_v4 }
  0x12   :  { %v104_v11 = vmax.f32 %v88_v3, 0.0  ;;  %v281_v13 = vpack.c.bf16 %v101_v5, %v100_v0  ;;  %v105_v14 = vmax.f32 %v89_v8, 0.0 }
  0x13   :  { %v106_v15 = vmax.f32 %v90_v9, 0.0  ;;  %v286_v16 = vpack.c.bf16 %v103_v10, %v102_v6  ;;  %v107_v17 = vmax.f32 %v91_v12, 0.0 }
  0x14   :  { %308 = vst [vmem:[%s425_s3 + $0x20] sm:$0xff] %v281_v13   ;;  %v291_v1 = vpack.c.bf16 %v105_v14, %v104_v11 }
  0x15   :  { %309 = vst [vmem:[%s425_s3 + $0x28] sm:$0xff] %v286_v16   ;;  %v296_v18 = vpack.c.bf16 %v107_v17, %v106_v15 }
  0x16   :  { %310 = vst [vmem:[%s425_s3 + $0x30] sm:$0xff] %v291_v1  }
  0x17   :  { %311 = vst [vmem:[%s425_s3 + $0x38] sm:$0xff] %v296_v18  }

// kernel: generator_forward.13
= control target key start
LH: loop header
LB: loop body
LE: loop exit
PB: predicated region body
PF: predicated region fallthrough
CT: control target
= control target key end

     0   :  { %s942_s9 = smov 0   ;;  %s944_s10 = smov 0   ;;  %s1020_s0 = inlined_call_operand.vmem [shape: bf16[4,128,128], index: 0, kind: input, shape index: {}]   ;;  %s1021_s1 = inlined_call_operand.vmem [shape: bf16[4,128,128], index: 1, kind: input, shape index: {}]   ;;  %s1022_s2 = inlined_call_operand.vmem [shape: f32[4,128,128], index: 2, kind: output, shape index: {}]  }
   0x1   :  { %s946_s11 = smov 0  }
   0x2 LB: > { %s38_s12 = sadd.s32 1, %s921_s10  ;;  %p739_p0 = scmp.ge.s32.totalorder %s925_s11, 1  ;;  %s925_s11 = sphi %s946_s11, %s12_s11   ;;  %s921_s10 = sphi %s944_s10, %s1024_s10   ;;  %s917_s9 = sphi %s942_s9, %s1023_s9  }
   0x3   : > { %p40_p1 = scmp.ge.s32.totalorder %s38_s12, 4  ;;  %p176_p2 = scmp.lt.s32.totalorder %s925_s11, 5 }
   0x5   : > { %s1026_s12 = smov (%p40_p1, %s38_s12), 0  ;;  %p177_p3 = pnand %p739_p0, %p176_p2 }
   0x6   : > { %p225_p4 = scmp.lt.s32.totalorder (!%p177_p3), %s917_s9, 3 }
   0x7   : > { %180 = sbr.rel (%p177_p3) target bundleno = 271 (0x10f), region = 28 }
   0xc   : > { %s1028_s9 = smov (!%p225_p4, %s917_s9), 3 }
   0xd   : > { %s764_s13 = sshll.u32 %s1028_s9, 6  ;;  %s766_s20 = sshll.u32 %s1028_s9, 7 }
   0xe   : > { %s966_s16 = scalar_lea.vmem %s1021_s1, %s764_s13  ;;  %s974_s19 = scalar_lea.vmem %s1020_s0, %s764_s13 }
   0xf   : > { %v855_v0 = vld [vmem:[%s966_s16 + $0x38] sm:$0xff]   ;;  %v856_v1 = vld [vmem:[%s966_s16 + $0x30] sm:$0xff]   ;;  %v857_v2 = vld [vmem:[%s966_s16 + $0x28] sm:$0xff]   ;;  %s993_s23 = scalar_lea.vmem %s1022_s2, %s766_s20 }
  0x10   : > { %783 = vmatprep.subr.bf16.mxu0 %v855_v0  ;;  %815 = vmatprep.subr.bf16.mxu1 %v855_v0  ;;  %v858_v3 = vld [vmem:[%s966_s16 + $0x20] sm:$0xff]   ;;  %v859_v6 = vld [vmem:[%s966_s16 + $0x18] sm:$0xff]   ;;  %v860_v7 = vld [vmem:[%s966_s16 + $0x10] sm:$0xff]  }
  0x11   : > { %784 = vmatpush3.bf16.msra.mxu0 %v855_v0  ;;  %823 = vmatpush3.bf16.msra.mxu1 %v855_v0  ;;  %v863_v4 = vld [vmem:[%s974_s19] sm:$0xff]   ;;  %v861_v8 = vld [vmem:[%s966_s16 + $0x8] sm:$0xff]   ;;  %v867_v12 = vld [vmem:[%s974_s19 + $0x10] sm:$0xff]  }
  0x12   : > { %785 = vmatprep.subr.bf16.mxu0 %v856_v1  ;;  %816 = vmatprep.subr.bf16.mxu1 %v856_v1  ;;  %v864_v5 = vld [vmem:[%s974_s19 + $0x20] sm:$0xff]   ;;  %v865_v10 = vld [vmem:[%s974_s19 + $0x8] sm:$0xff]   ;;  %v868_v13 = vld [vmem:[%s974_s19 + $0x30] sm:$0xff]  }
  0x13   : > { %799 = vmatprep.mubr.bf16.mxu0 %v863_v4  ;;  %807 = vmatprep.mubr.bf16.mxu1 %v864_v5  ;;  %v862_v9 = vld [vmem:[%s966_s16] sm:$0xff]   ;;  %v866_v11 = vld [vmem:[%s974_s19 + $0x28] sm:$0xff]   ;;  %v869_v14 = vld [vmem:[%s974_s19 + $0x18] sm:$0xff]  }
  0x14   : > { %v870_v15 = vld [vmem:[%s974_s19 + $0x38] sm:$0xff]  }
  0x15   : > { %786 = vmatpush3.bf16.msra.mxu0 %v856_v1  ;;  %824 = vmatpush3.bf16.msra.mxu1 %v856_v1 }
  0x16   : > { %787 = vmatprep.subr.bf16.mxu0 %v857_v2  ;;  %817 = vmatprep.subr.bf16.mxu1 %v857_v2 }
  0x19   : > { %788 = vmatpush3.bf16.msra.mxu0 %v857_v2  ;;  %825 = vmatpush3.bf16.msra.mxu1 %v857_v2 }
  0x1a   : > { %789 = vmatprep.subr.bf16.mxu0 %v858_v3  ;;  %818 = vmatprep.subr.bf16.mxu1 %v858_v3 }
  0x1d   : > { %790 = vmatpush3.bf16.msra.mxu0 %v858_v3  ;;  %826 = vmatpush3.bf16.msra.mxu1 %v858_v3 }
  0x1e   : > { %791 = vmatprep.subr.bf16.mxu0 %v859_v6  ;;  %819 = vmatprep.subr.bf16.mxu1 %v859_v6 }
  0x21   : > { %792 = vmatpush3.bf16.msra.mxu0 %v859_v6  ;;  %827 = vmatpush3.bf16.msra.mxu1 %v859_v6 }
  0x22   : > { %793 = vmatprep.subr.bf16.mxu0 %v860_v7  ;;  %820 = vmatprep.subr.bf16.mxu1 %v860_v7 }
  0x25   : > { %794 = vmatpush3.bf16.msra.mxu0 %v860_v7  ;;  %828 = vmatpush3.bf16.msra.mxu1 %v860_v7 }
  0x26   : > { %795 = vmatprep.subr.bf16.mxu0 %v861_v8  ;;  %821 = vmatprep.subr.bf16.mxu1 %v861_v8 }
  0x29   : > { %796 = vmatpush3.bf16.msra.mxu0 %v861_v8  ;;  %829 = vmatpush3.bf16.msra.mxu1 %v861_v8 }
  0x2a   : > { %797 = vmatprep.subr.bf16.mxu0 %v862_v9  ;;  %822 = vmatprep.subr.bf16.mxu1 %v862_v9 }
  0x2d   : > { %798 = vmatpush3.bf16.msra.mxu0 %v862_v9  ;;  %830 = vmatpush3.bf16.msra.mxu1 %v862_v9 }
  0x30   : > { %800 = vmatmul.mubr.bf16.vlgmr.msra.gmra.mxu0 %v865_v10  ;;  %808 = vmatmul.mubr.bf16.vlgmr.msra.gmra.mxu1 %v866_v11 }
  0x31   : > { %803 = vmatprep.mubr.bf16.mxu0 %v867_v12  ;;  %811 = vmatprep.mubr.bf16.mxu1 %v868_v13 }
  0x38   : > { %804 = vmatmul.mubr.bf16.gmra.mxu0 %v869_v14  ;;  %812 = vmatmul.mubr.bf16.gmra.mxu1 %v870_v15 }
  0xf0   : > { %v801_v16 = vpop.f32.mrf.mxu0  ;;  %v809_v17 = vpop.f32.mrf.mxu1 }
  0xf1   : > { %871 = vtanh.f32 %v801_v16 }
  0xf2   : > { %873 = vtanh.f32 %v809_v17  ;;  %v462_v18 = vpop.f32.mrf.mxu0  ;;  %v494_v19 = vpop.f32.mrf.mxu1 }
  0xf3   : > { %875 = vtanh.f32 %v462_v18 }
  0xf4   : > { %877 = vtanh.f32 %v494_v19  ;;  %v802_v20 = vpop.f32.mrf.mxu0  ;;  %v810_v21 = vpop.f32.mrf.mxu1 }
  0xf5   : > { %879 = vtanh.f32 %v802_v20 }
  0xf6   : > { %881 = vtanh.f32 %v810_v21  ;;  %v465_v22 = vpop.f32.mrf.mxu0  ;;  %v497_v23 = vpop.f32.mrf.mxu1 }
  0xf7   : > { %883 = vtanh.f32 %v465_v22 }
  0xf8   : > { %885 = vtanh.f32 %v497_v23  ;;  %v805_v24 = vpop.f32.mrf.mxu0  ;;  %v813_v25 = vpop.f32.mrf.mxu1 }
  0xf9   : > { %887 = vtanh.f32 %v805_v24 }
  0xfa   : > { %889 = vtanh.f32 %v813_v25  ;;  %v478_v26 = vpop.f32.mrf.mxu0  ;;  %v510_v27 = vpop.f32.mrf.mxu1 }
  0xfb   : > { %891 = vtanh.f32 %v478_v26 }
  0xfc   : > { %893 = vtanh.f32 %v510_v27  ;;  %v806_v28 = vpop.f32.mrf.mxu0  ;;  %v814_v29 = vpop.f32.mrf.mxu1 }
  0xfd   : > { %895 = vtanh.f32 %v806_v28 }
  0xfe   : > { %v872_v30 = vpop.eup %871  ;;  %897 = vtanh.f32 %v814_v29  ;;  %v481_v31 = vpop.f32.mrf.mxu0 }
  0xff   : > { %v513_v32 = vpop.f32.mrf.mxu1  ;;  %v874_v33 = vpop.eup %873  ;;  %594 = vst [vmem:[%s993_s23 + $0x10] sm:$0xff] %v872_v30  ;;  %899 = vtanh.f32 %v481_v31 }
 0x100   : > { %v876_v34 = vpop.eup %875  ;;  %602 = vst [vmem:[%s993_s23 + $0x50] sm:$0xff] %v874_v33  ;;  %901 = vtanh.f32 %v513_v32 }
 0x101   : > { %v878_v35 = vpop.eup %877  ;;  %592 = vst [vmem:[%s993_s23] sm:$0xff] %v876_v34 }
 0x102   : > { %v880_v36 = vpop.eup %879  ;;  %600 = vst [vmem:[%s993_s23 + $0x40] sm:$0xff] %v878_v35 }
 0x103   : > { %v882_v37 = vpop.eup %881  ;;  %595 = vst [vmem:[%s993_s23 + $0x18] sm:$0xff] %v880_v36 }
 0x104   : > { %v884_v38 = vpop.eup %883  ;;  %603 = vst [vmem:[%s993_s23 + $0x58] sm:$0xff] %v882_v37 }
 0x105   : > { %v886_v39 = vpop.eup %885  ;;  %593 = vst [vmem:[%s993_s23 + $0x8] sm:$0xff] %v884_v38 }
 0x106   : > { %v888_v40 = vpop.eup %887  ;;  %601 = vst [vmem:[%s993_s23 + $0x48] sm:$0xff] %v886_v39 }
 0x107   : > { %v890_v41 = vpop.eup %889  ;;  %598 = vst [vmem:[%s993_s23 + $0x30] sm:$0xff] %v888_v40 }
 0x108   : > { %v892_v42 = vpop.eup %891  ;;  %606 = vst [vmem:[%s993_s23 + $0x70] sm:$0xff] %v890_v41 }
 0x109   : > { %v894_v43 = vpop.eup %893  ;;  %596 = vst [vmem:[%s993_s23 + $0x20] sm:$0xff] %v892_v42 }
 0x10a   : > { %v896_v44 = vpop.eup %895  ;;  %604 = vst [vmem:[%s993_s23 + $0x60] sm:$0xff] %v894_v43 }
 0x10b   : > { %v898_v45 = vpop.eup %897  ;;  %599 = vst [vmem:[%s993_s23 + $0x38] sm:$0xff] %v896_v44 }
 0x10c   : > { %v900_v46 = vpop.eup %899  ;;  %607 = vst [vmem:[%s993_s23 + $0x78] sm:$0xff] %v898_v45 }
 0x10d   : > { %v902_v47 = vpop.eup %901  ;;  %597 = vst [vmem:[%s993_s23 + $0x28] sm:$0xff] %v900_v46 }
 0x10e   : > { %605 = vst [vmem:[%s993_s23 + $0x68] sm:$0xff] %v902_v47 }
 0x10f PF: > { %s12_s11 = sadd.s32 1, %s925_s11   ;;  %s1023_s9 = smov %s921_s10 }
 0x110   : > { %p9_p5 = scmp.ge.s32.totalorder %s12_s11, 6   ;;  %s1024_s10 = smov %s1026_s12 }
 0x112   :  { %11 = sbr.rel (!%p9_p5) target bundleno = 2 (0x2), region = 69 }

</bundles_post_ra>
